<compile_context>
chip_gen: v7x
topology: tpu7x:2x2x1
jax: 0.10.0
libtpu: 0.0.40
codegen_flags: <defaults>
</compile_context>

<pallas_src>
import jax
import jax.numpy as jnp
from jax.experimental import pallas as pl
from jax.experimental.pallas import tpu as pltpu

LANE = 128
SUBLANE = 8


def _round_up(n, m):
    return ((n + m - 1) // m) * m


def _elu(v):
    # PyTorch nn.ELU(alpha=1.0): x if x > 0 else exp(x) - 1
    return jnp.where(v > 0, v, jnp.exp(jnp.minimum(v, 0.0)) - 1.0)


def odenet_kernel(x_ref, t_ref, w_ref, v_ref, out_ref):
    """One batch tile of the ODEnet forward.

    x_ref  : (TB, P)    zero-padded input features
    t_ref  : (TB, 1)    time column
    w_ref  : (4, P, P)  stacked zero-padded weights [w_in, w_l1, w_l2, w_out],
                        each stored (in_features, out_features)
    v_ref  : (8, P)     stacked rows [b_in, w_t_row, b_t, b_l1, b_l2, b_out, 0, 0]
    out_ref: (TB, P)    lane-dense padded output
    """
    x = x_ref[...]                     # (TB, P)
    t = t_ref[...]                     # (TB, 1)
    v = v_ref[...]                     # (8, P)

    b_in, w_t, b_t = v[0:1, :], v[1:2, :], v[2:3, :]
    b_l1, b_l2, b_out = v[3:4, :], v[4:5, :], v[5:6, :]

    # input_embed: Linear(D, H) + ELU  (MXU)
    h = _elu(jnp.dot(x, w_ref[0], preferred_element_type=jnp.float32) + b_in)

    # time_embed: Linear(1, H) + ELU as a VPU broadcast outer product (no K=1 matmul)
    h = h + _elu(t * w_t + b_t)

    # hidden layers: Linear(H, H) + ELU  (MXU)
    h = _elu(jnp.dot(h, w_ref[1], preferred_element_type=jnp.float32) + b_l1)
    h = _elu(jnp.dot(h, w_ref[2], preferred_element_type=jnp.float32) + b_l2)

    # out_layer: Linear(H, D), no activation
    out_ref[...] = jnp.dot(h, w_ref[3], preferred_element_type=jnp.float32) + b_out


def pack_params(params, input_dim, hidden_dim):
    """Zero-pad to lane-dense (P=128 multiple) shapes and pack into 2 arrays."""
    D, H = input_dim, hidden_dim
    P = _round_up(max(D, H), LANE)

    def pad_mat(a):
        r, c = a.shape
        return jnp.pad(a.astype(jnp.float32), ((0, P - r), (0, P - c)))

    def pad_row(a):
        a = a.reshape(1, -1).astype(jnp.float32)
        return jnp.pad(a, ((0, 0), (0, P - a.shape[1])))

    w_stack = jnp.stack(
        [pad_mat(params["w_in"]), pad_mat(params["w_l1"]),
         pad_mat(params["w_l2"]), pad_mat(params["w_out"])]
    )  # (4, P, P)

    v_stack = jnp.concatenate(
        [pad_row(params["b_in"]), pad_row(params["w_t"]), pad_row(params["b_t"]),
         pad_row(params["b_l1"]), pad_row(params["b_l2"]), pad_row(params["b_out"]),
         jnp.zeros((2, P), jnp.float32)],
        axis=0,
    )  # (8, P)
    return w_stack, v_stack


@jax.jit
def odenet_forward(t, x, w_stack, v_stack):
    """t: (B,) f32, x: (B, D) f32, packed params from pack_params."""
    B, D = x.shape
    P = w_stack.shape[-1]

    tile_b = min(512, _round_up(B, SUBLANE))
    b_pad = _round_up(B, tile_b)

    x_p = jnp.zeros((b_pad, P), jnp.float32).at[:B, :D].set(x.astype(jnp.float32))
    t_p = jnp.zeros((b_pad, 1), jnp.float32).at[:B, 0].set(t.astype(jnp.float32))

    cost = pl.CostEstimate(
        flops=int(2 * b_pad * P * P * 4 + 6 * b_pad * P),
        transcendentals=int(4 * b_pad * P),
        bytes_accessed=int(4 * (x_p.size + t_p.size + w_stack.size
                                + v_stack.size + b_pad * P)),
    )

    out_p = pl.pallas_call(
        odenet_kernel,
        out_shape=jax.ShapeDtypeStruct((b_pad, P), jnp.float32),
        grid=(b_pad // tile_b,),
        in_specs=[
            pl.BlockSpec((tile_b, P), lambda i: (i, 0)),    # x: streams over batch
            pl.BlockSpec((tile_b, 1), lambda i: (i, 0)),    # t: streams over batch
            pl.BlockSpec((4, P, P), lambda i: (0, 0, 0)),   # weights: resident
            pl.BlockSpec((8, P), lambda i: (0, 0)),         # biases:  resident
        ],
        out_specs=pl.BlockSpec((tile_b, P), lambda i: (i, 0)),
        compiler_params=pltpu.CompilerParams(
            dimension_semantics=("parallel",)),
        cost_estimate=cost,
    )(x_p, t_p, w_stack, v_stack)

    return out_p[:B, :D]


def make_params(key, input_dim, hidden_dim):
    """Deterministic synthetic parameters (PyTorch-shaped, stored transposed)."""
    ks = jax.random.split(key, 10)

    def w(k, shape, fan_in):
        bound = 1.0 / jnp.sqrt(jnp.float32(fan_in))
        return jax.random.uniform(k, shape, jnp.float32, -bound, bound)

    D, H = input_dim, hidden_dim
    return {
        "w_t":   w(ks[0], (1, H), 1),    # time_embed: Linear(1, H)
        "b_t":   w(ks[1], (1, H), 1),
        "w_in":  w(ks[2], (D, H), D),    # input_embed: Linear(D, H)
        "b_in":  w(ks[3], (1, H), D),
        "w_l1":  w(ks[4], (H, H), H),    # layers[0]
        "b_l1":  w(ks[5], (1, H), H),
        "w_l2":  w(ks[6], (H, H), H),    # layers[1]
        "b_l2":  w(ks[7], (1, H), H),
        "w_out": w(ks[8], (H, D), H),    # out_layer: Linear(H, D)
        "b_out": w(ks[9], (1, D), H),
    }


def odenet_reference(t, x, p):
    """Pure-JAX reference mirroring the PyTorch forward, for validation."""
    hp = jax.lax.Precision.HIGHEST

    def elu(v):
        return jnp.where(v > 0, v, jnp.exp(jnp.minimum(v, 0.0)) - 1.0)

    h = elu(jnp.dot(x, p["w_in"], precision=hp) + p["b_in"])
    h = h + elu(t.reshape(-1, 1) * p["w_t"] + p["b_t"])
    h = elu(jnp.dot(h, p["w_l1"], precision=hp) + p["b_l1"])
    h = elu(jnp.dot(h, p["w_l2"], precision=hp) + p["b_l2"])
    return jnp.dot(h, p["w_out"], precision=hp) + p["b_out"]


if __name__ == "__main__":
    key = jax.random.PRNGKey(0)
    k_x, k_t, k_p = jax.random.split(key, 3)

    batch = 8
    input_dim = 4
    hidden_dim = 32

    x = jax.random.normal(k_x, (batch, input_dim), jnp.float32)
    t = jax.random.normal(k_t, (batch,), jnp.float32)
    params = make_params(k_p, input_dim, hidden_dim)

    # Pack / pad once (amortized across however many forward calls follow).
    w_stack, v_stack = pack_params(params, input_dim, hidden_dim)

    out = odenet_forward(t, x, w_stack, v_stack)
    out = jax.block_until_ready(out)

    ref = odenet_reference(t, x, params)
    assert out.shape == (batch, input_dim)
    assert jnp.allclose(out, ref, atol=1e-4, rtol=1e-4), float(
        jnp.max(jnp.abs(out - ref)))

    print("KERNEL_OK")
</pallas_src>

<mosaic_0001>
module attributes {stable_mosaic.version = 11 : i64} {
  func.func @odenet_kernel(%arg0: i32, %arg1: memref<8x128xf32, #tpu.memory_space<vmem>>, %arg2: memref<8x1xf32, #tpu.memory_space<vmem>>, %arg3: memref<4x128x128xf32, #tpu.memory_space<vmem>>, %arg4: memref<8x128xf32, #tpu.memory_space<vmem>>, %arg5: memref<8x128xf32, #tpu.memory_space<vmem>>) attributes {dimension_semantics = [#tpu.dimension_semantics<parallel>], iteration_bounds = array<i64: 1>, scalar_prefetch = 0 : i64, scratch_operands = 0 : i64, tpu.core_type = #tpu.core_type<tc>, window_params = [{transform_indices = @transform_0, window_bounds = array<i64: 8, 128>}, {transform_indices = @transform_1, window_bounds = array<i64: 8, 1>}, {pipeline_mode = #tpu.pipeline_mode<synchronous>, transform_indices = @transform_2, window_bounds = array<i64: 4, 128, 128>}, {pipeline_mode = #tpu.pipeline_mode<synchronous>, transform_indices = @transform_3, window_bounds = array<i64: 8, 128>}, {transform_indices = @transform_4, window_bounds = array<i64: 8, 128>}]} {
    %c0 = arith.constant 0 : index
    %c0_0 = arith.constant 0 : index
    %0 = vector.load %arg1[%c0, %c0_0] : memref<8x128xf32, #tpu.memory_space<vmem>>, vector<8x128xf32>
    %c0_1 = arith.constant 0 : index
    %c0_2 = arith.constant 0 : index
    %1 = vector.load %arg2[%c0_1, %c0_2] : memref<8x1xf32, #tpu.memory_space<vmem>>, vector<8x1xf32>
    %c0_3 = arith.constant 0 : index
    %c0_4 = arith.constant 0 : index
    %2 = vector.load %arg4[%c0_3, %c0_4] : memref<8x128xf32, #tpu.memory_space<vmem>>, vector<8x128xf32>
    %3 = vector.extract_strided_slice %2 {offsets = [0, 0], sizes = [1, 128], strides = [1, 1]} : vector<8x128xf32> to vector<1x128xf32>
    %4 = vector.extract_strided_slice %2 {offsets = [1, 0], sizes = [1, 128], strides = [1, 1]} : vector<8x128xf32> to vector<1x128xf32>
    %5 = vector.extract_strided_slice %2 {offsets = [2, 0], sizes = [1, 128], strides = [1, 1]} : vector<8x128xf32> to vector<1x128xf32>
    %6 = vector.extract_strided_slice %2 {offsets = [3, 0], sizes = [1, 128], strides = [1, 1]} : vector<8x128xf32> to vector<1x128xf32>
    %7 = vector.extract_strided_slice %2 {offsets = [4, 0], sizes = [1, 128], strides = [1, 1]} : vector<8x128xf32> to vector<1x128xf32>
    %8 = vector.extract_strided_slice %2 {offsets = [5, 0], sizes = [1, 128], strides = [1, 1]} : vector<8x128xf32> to vector<1x128xf32>
    %c0_5 = arith.constant 0 : index
    %c0_6 = arith.constant 0 : index
    %c0_7 = arith.constant 0 : index
    %9 = vector.load %arg3[%c0_5, %c0_6, %c0_7] : memref<4x128x128xf32, #tpu.memory_space<vmem>>, vector<1x128x128xf32>
    %10 = vector.shape_cast %9 : vector<1x128x128xf32> to vector<128x128xf32>
    %cst = arith.constant dense<0.000000e+00> : vector<8x128xf32>
    %11 = tpu.matmul %0, %10, %cst {dimension_numbers = #tpu.dot_dimension_numbers<[1], [0], [0], [1], [0, 0, 1, 1], [], []>} : vector<8x128xf32>, vector<128x128xf32>, vector<8x128xf32> -> vector<8x128xf32>
    %12 = vector.broadcast %3 : vector<1x128xf32> to vector<8x128xf32>
    %13 = arith.addf %11, %12 : vector<8x128xf32>
    %cst_8 = arith.constant 0.000000e+00 : f32
    %14 = vector.broadcast %cst_8 : f32 to vector<8x128xf32>
    %15 = arith.cmpf ogt, %13, %14 : vector<8x128xf32>
    %cst_9 = arith.constant 0.000000e+00 : f32
    %16 = vector.broadcast %cst_9 : f32 to vector<8x128xf32>
    %17 = arith.minimumf %13, %16 : vector<8x128xf32>
    %18 = math.exp %17 : vector<8x128xf32>
    %cst_10 = arith.constant 1.000000e+00 : f32
    %19 = vector.broadcast %cst_10 : f32 to vector<8x128xf32>
    %20 = arith.subf %18, %19 : vector<8x128xf32>
    %21 = arith.select %15, %13, %20 : vector<8x128xi1>, vector<8x128xf32>
    %22 = vector.broadcast %1 : vector<8x1xf32> to vector<8x128xf32>
    %23 = vector.broadcast %4 : vector<1x128xf32> to vector<8x128xf32>
    %24 = arith.mulf %22, %23 : vector<8x128xf32>
    %25 = vector.broadcast %5 : vector<1x128xf32> to vector<8x128xf32>
    %26 = arith.addf %24, %25 : vector<8x128xf32>
    %cst_11 = arith.constant 0.000000e+00 : f32
    %27 = vector.broadcast %cst_11 : f32 to vector<8x128xf32>
    %28 = arith.cmpf ogt, %26, %27 : vector<8x128xf32>
    %cst_12 = arith.constant 0.000000e+00 : f32
    %29 = vector.broadcast %cst_12 : f32 to vector<8x128xf32>
    %30 = arith.minimumf %26, %29 : vector<8x128xf32>
    %31 = math.exp %30 : vector<8x128xf32>
    %cst_13 = arith.constant 1.000000e+00 : f32
    %32 = vector.broadcast %cst_13 : f32 to vector<8x128xf32>
    %33 = arith.subf %31, %32 : vector<8x128xf32>
    %34 = arith.select %28, %26, %33 : vector<8x128xi1>, vector<8x128xf32>
    %35 = arith.addf %21, %34 : vector<8x128xf32>
    %c1 = arith.constant 1 : index
    %c0_14 = arith.constant 0 : index
    %c0_15 = arith.constant 0 : index
    %36 = vector.load %arg3[%c1, %c0_14, %c0_15] : memref<4x128x128xf32, #tpu.memory_space<vmem>>, vector<1x128x128xf32>
    %37 = vector.shape_cast %36 : vector<1x128x128xf32> to vector<128x128xf32>
    %cst_16 = arith.constant dense<0.000000e+00> : vector<8x128xf32>
    %38 = tpu.matmul %35, %37, %cst_16 {dimension_numbers = #tpu.dot_dimension_numbers<[1], [0], [0], [1], [0, 0, 1, 1], [], []>} : vector<8x128xf32>, vector<128x128xf32>, vector<8x128xf32> -> vector<8x128xf32>
    %39 = vector.broadcast %6 : vector<1x128xf32> to vector<8x128xf32>
    %40 = arith.addf %38, %39 : vector<8x128xf32>
    %cst_17 = arith.constant 0.000000e+00 : f32
    %41 = vector.broadcast %cst_17 : f32 to vector<8x128xf32>
    %42 = arith.cmpf ogt, %40, %41 : vector<8x128xf32>
    %cst_18 = arith.constant 0.000000e+00 : f32
    %43 = vector.broadcast %cst_18 : f32 to vector<8x128xf32>
    %44 = arith.minimumf %40, %43 : vector<8x128xf32>
    %45 = math.exp %44 : vector<8x128xf32>
    %cst_19 = arith.constant 1.000000e+00 : f32
    %46 = vector.broadcast %cst_19 : f32 to vector<8x128xf32>
    %47 = arith.subf %45, %46 : vector<8x128xf32>
    %48 = arith.select %42, %40, %47 : vector<8x128xi1>, vector<8x128xf32>
    %c2 = arith.constant 2 : index
    %c0_20 = arith.constant 0 : index
    %c0_21 = arith.constant 0 : index
    %49 = vector.load %arg3[%c2, %c0_20, %c0_21] : memref<4x128x128xf32, #tpu.memory_space<vmem>>, vector<1x128x128xf32>
    %50 = vector.shape_cast %49 : vector<1x128x128xf32> to vector<128x128xf32>
    %cst_22 = arith.constant dense<0.000000e+00> : vector<8x128xf32>
    %51 = tpu.matmul %48, %50, %cst_22 {dimension_numbers = #tpu.dot_dimension_numbers<[1], [0], [0], [1], [0, 0, 1, 1], [], []>} : vector<8x128xf32>, vector<128x128xf32>, vector<8x128xf32> -> vector<8x128xf32>
    %52 = vector.broadcast %7 : vector<1x128xf32> to vector<8x128xf32>
    %53 = arith.addf %51, %52 : vector<8x128xf32>
    %cst_23 = arith.constant 0.000000e+00 : f32
    %54 = vector.broadcast %cst_23 : f32 to vector<8x128xf32>
    %55 = arith.cmpf ogt, %53, %54 : vector<8x128xf32>
    %cst_24 = arith.constant 0.000000e+00 : f32
    %56 = vector.broadcast %cst_24 : f32 to vector<8x128xf32>
    %57 = arith.minimumf %53, %56 : vector<8x128xf32>
    %58 = math.exp %57 : vector<8x128xf32>
    %cst_25 = arith.constant 1.000000e+00 : f32
    %59 = vector.broadcast %cst_25 : f32 to vector<8x128xf32>
    %60 = arith.subf %58, %59 : vector<8x128xf32>
    %61 = arith.select %55, %53, %60 : vector<8x128xi1>, vector<8x128xf32>
    %c3 = arith.constant 3 : index
    %c0_26 = arith.constant 0 : index
    %c0_27 = arith.constant 0 : index
    %62 = vector.load %arg3[%c3, %c0_26, %c0_27] : memref<4x128x128xf32, #tpu.memory_space<vmem>>, vector<1x128x128xf32>
    %63 = vector.shape_cast %62 : vector<1x128x128xf32> to vector<128x128xf32>
    %cst_28 = arith.constant dense<0.000000e+00> : vector<8x128xf32>
    %64 = tpu.matmul %61, %63, %cst_28 {dimension_numbers = #tpu.dot_dimension_numbers<[1], [0], [0], [1], [0, 0, 1, 1], [], []>} : vector<8x128xf32>, vector<128x128xf32>, vector<8x128xf32> -> vector<8x128xf32>
    %65 = vector.broadcast %8 : vector<1x128xf32> to vector<8x128xf32>
    %66 = arith.addf %64, %65 : vector<8x128xf32>
    %c0_29 = arith.constant 0 : index
    %c0_30 = arith.constant 0 : index
    %67 = vector.load %arg5[%c0_29, %c0_30] : memref<8x128xf32, #tpu.memory_space<vmem>>, vector<8x128xf32>
    tpu.vector_store %arg5[%c0_29, %c0_30], %66 {strides = array<i32>} : memref<8x128xf32, #tpu.memory_space<vmem>>, vector<8x128xf32>,
    return
  }
  func.func @transform_0(%arg0: i32) -> (i32, i32) {
    %c0_i32 = arith.constant 0 : i32
    %c0_i32_0 = arith.constant 0 : i32
    return %arg0, %c0_i32 : i32, i32
  }
  func.func @transform_1(%arg0: i32) -> (i32, i32) {
    %c0_i32 = arith.constant 0 : i32
    %c0_i32_0 = arith.constant 0 : i32
    return %arg0, %c0_i32 : i32, i32
  }
  func.func @transform_2(%arg0: i32) -> (i32, i32, i32) {
    %c0_i32 = arith.constant 0 : i32
    %c0_i32_0 = arith.constant 0 : i32
    %c0_i32_1 = arith.constant 0 : i32
    %c0_i32_2 = arith.constant 0 : i32
    return %c0_i32, %c0_i32_0, %c0_i32_1 : i32, i32, i32
  }
  func.func @transform_3(%arg0: i32) -> (i32, i32) {
    %c0_i32 = arith.constant 0 : i32
    %c0_i32_0 = arith.constant 0 : i32
    %c0_i32_1 = arith.constant 0 : i32
    return %c0_i32, %c0_i32_0 : i32, i32
  }
  func.func @transform_4(%arg0: i32) -> (i32, i32) {
    %c0_i32 = arith.constant 0 : i32
    %c0_i32_0 = arith.constant 0 : i32
    return %arg0, %c0_i32 : i32, i32
  }
}

</mosaic_0001>

<bundles_post_ra>
// kernel: odenet_forward.1
= control target key start
LH: loop header
LB: loop body
LE: loop exit
PB: predicated region body
PF: predicated region fallthrough
CT: control target
= control target key end

     0   :  { %9 = vsyncpa [#allocation3], 0  ;;  %s791_s15 = smov [#allocation2]   ;;  %s903_s0 = inlined_call_operand.vmem [shape: f32[8,128], index: 0, kind: input, shape index: {}]   ;;  %s904_s1 = inlined_call_operand.vmem [shape: f32[8,1], index: 1, kind: input, shape index: {}]   ;;  %s905_s2 = inlined_call_operand.hbm [shape: f32[4,128,128], index: 2, kind: input, shape index: {}]   ;;  %s906_s3 = inlined_call_operand.vmem [shape: f32[8,128], index: 3, kind: input, shape index: {}]   ;;  %s907_s4 = inlined_call_operand.vmem [shape: f32[8,128], index: 4, kind: output, shape index: {}]  }
   0x1   :  { %s19_s16 = sshll.u32 %s791_s15, 4  ;;  %s767_s19 = scalar_lea.hbm %s905_s2, 8192  ;;  %s20_s16 = int_to_ptr.vmem [resolvable:$true] %s19_s16 }
   0x2   :  { %p768_p0 = scmp.ne.s32.totalorder %s905_s2, %s767_s19  ;;  %p771_p1 = scmp.lt.u32.totalorder %s767_s19, %s905_s2 }
   0x4   :  { %p773_p2 = pnand %p771_p1, %p768_p0 }
   0x6   :  { %776 = shalt.err (!%p773_p2)
}
   0x7   :  { %s777_s24 = scalar_lea.vmem %s20_s16, 8192  ;;  %p782_p4 = scmp.lt.s32.totalorder %s20_s16, %s20_s16 }
   0x8   :  { %p778_p3 = scmp.ne.s32.totalorder %s20_s16, %s777_s24  ;;  %p783_p5 = scmp.lt.s32.totalorder %s777_s24, %s777_s24 }
   0xa   :  { %p784_p6 = por %p783_p5, %p782_p4 }
   0xc   :  { %p785_p7 = pnand %p784_p6, %p778_p3 }
   0xe   :  { %788 = shalt.err (!%p785_p7)
}
   0xf   :  { %s792_s25 = smov 128   ;;  %s793_s26 = smov 8  }
  0x10   :  { %25 = dma.hbm_to_vmem [thread:$0]  %s905_s2, 8192, %s20_s16, [#allocation3], %s792_s25, %s792_s25, %s793_s26  }
  0x11   :  { %789 = dma.done.wait [#allocation3], 8192  }
  0x12   :  { %790 = vsyncadd [#allocation3], 4294959104  ;;  %v794_v0 = vmov 0.0|0.0   ;;  %vm795_vm0 = vmmov 0   ;;  %v796_v1 = vmov 0.0   ;;  %v797_v2 = vmov 0  }
  0x13   :  { %655 = vmatprep.subr.bf16.mxu0 %v794_v0  ;;  %547 = vmatprep.mubr.msk.f32.mxu0 %vm795_vm0, %v796_v1  ;;  %v34_v3 = vld [vmem:[#allocation2] sm:$0xff]  ;;  %v35_v4 = vld [vmem:[#allocation2 + $0x8] sm:$0xff]  ;;  %v36_v5 = vld [vmem:[#allocation2 + $0x10] sm:$0xff]  ;;  %v50_v62 = vlaneseq }
  0x14   :  { %758 = vset.pattern.permute.xlu0 %v797_v2  ;;  %679 = vmatprep.subr.bf16.mxu1 %v794_v0  ;;  %v656_v6 = vpack.c.bf16 %v35_v4, %v34_v3  ;;  %v37_v7 = vld [vmem:[#allocation2 + $0x18] sm:$0xff]  ;;  %v38_v9 = vld [vmem:[#allocation2 + $0x20] sm:$0xff]  ;;  %v39_v10 = vld [vmem:[#allocation2 + $0x28] sm:$0xff] }
  0x15   :  { %582 = vmatprep.mubr.msk.f32.mxu1 %vm795_vm0, %v796_v1  ;;  %v659_v8 = vpack.c.bf16 %v37_v7, %v36_v5  ;;  %v32_v11 = vld [vmem:[%s904_s1] sm:$0xff]  ;;  %v662_v12 = vpack.c.bf16 %v39_v10, %v38_v9  ;;  %v40_v13 = vld [vmem:[#allocation2 + $0x30] sm:$0xff]  ;;  %v41_v14 = vld [vmem:[#allocation2 + $0x38] sm:$0xff]  ;;  %v868_v63 = vshrl.u32 %v50_v62, 7 }
  0x16   :  { %657 = vmatpush3.bf16.msra.mxu0 %v656_v6  ;;  %132 = vperm.xlu0 %758, %v32_v11   ;;  %v665_v15 = vpack.c.bf16 %v41_v14, %v40_v13  ;;  %v42_v16 = vld [vmem:[#allocation2 + $0x40] sm:$0xff]  ;;  %v43_v17 = vld [vmem:[#allocation2 + $0x48] sm:$0xff]  ;;  %v155_v20 = vld [vmem:[#allocation2 + $0x90] sm:$0xff] }
  0x17   :  { %658 = vmatprep.subr.bf16.mxu0 %v794_v0  ;;  %v153_v18 = vld [vmem:[#allocation2 + $0x80] sm:$0xff]  ;;  %v154_v19 = vld [vmem:[#allocation2 + $0x88] sm:$0xff]  ;;  %v668_v21 = vpack.c.bf16 %v43_v17, %v42_v16  ;;  %v156_v23 = vld [vmem:[#allocation2 + $0x98] sm:$0xff]  ;;  %v137_v2 = vsub.s32 1, %v868_v63  ;;  %v142_v5 = vsub.s32 2, %v868_v63  ;;  %v52_v10 = vsub.s32 0, %v868_v63 }
  0x18   :  { %v680_v22 = vpack.c.bf16 %v154_v19, %v153_v18  ;;  %v44_v24 = vld [vmem:[#allocation2 + $0x50] sm:$0xff]  ;;  %v45_v25 = vld [vmem:[#allocation2 + $0x58] sm:$0xff]  ;;  %v683_v26 = vpack.c.bf16 %v156_v23, %v155_v20  ;;  %v46_v28 = vld [vmem:[#allocation2 + $0x60] sm:$0xff] }
  0x19   :  { %v671_v27 = vpack.c.bf16 %v45_v25, %v44_v24  ;;  %v47_v29 = vld [vmem:[#allocation2 + $0x68] sm:$0xff]  ;;  %v48_v31 = vld [vmem:[#allocation2 + $0x70] sm:$0xff]  ;;  %v49_v32 = vld [vmem:[#allocation2 + $0x78] sm:$0xff] }
  0x1a   :  { %660 = vmatpush3.bf16.msra.mxu0 %v659_v8  ;;  %681 = vmatpush3.bf16.msra.mxu1 %v680_v22  ;;  %v674_v30 = vpack.c.bf16 %v47_v29, %v46_v28  ;;  %v677_v33 = vpack.c.bf16 %v49_v32, %v48_v31  ;;  %v31_v34 = vld [vmem:[%s903_s0] sm:$0xff]  ;;  %v158_v36 = vld [vmem:[#allocation2 + $0xa8] sm:$0xff]  ;;  %v159_v38 = vld [vmem:[#allocation2 + $0xb0] sm:$0xff] }
  0x1b   :  { %661 = vmatprep.subr.bf16.mxu0 %v794_v0  ;;  %682 = vmatprep.subr.bf16.mxu1 %v794_v0  ;;  %v157_v35 = vld [vmem:[#allocation2 + $0xa0] sm:$0xff]  ;;  %v160_v39 = vld [vmem:[#allocation2 + $0xb8] sm:$0xff]  ;;  %v162_v42 = vld [vmem:[#allocation2 + $0xc8] sm:$0xff] }
  0x1c   :  { %v686_v37 = vpack.c.bf16 %v158_v36, %v157_v35  ;;  %v689_v40 = vpack.c.bf16 %v160_v39, %v159_v38  ;;  %v161_v41 = vld [vmem:[#allocation2 + $0xc0] sm:$0xff]  ;;  %v163_v44 = vld [vmem:[#allocation2 + $0xd0] sm:$0xff]  ;;  %v164_v45 = vld [vmem:[#allocation2 + $0xd8] sm:$0xff] }
  0x1d   :  { %v692_v43 = vpack.c.bf16 %v162_v42, %v161_v41  ;;  %v695_v46 = vpack.c.bf16 %v164_v45, %v163_v44  ;;  %v165_v47 = vld [vmem:[#allocation2 + $0xe0] sm:$0xff]  ;;  %v166_v48 = vld [vmem:[#allocation2 + $0xe8] sm:$0xff]  ;;  %v167_v50 = vld [vmem:[#allocation2 + $0xf0] sm:$0xff] }
  0x1e   :  { %663 = vmatpush3.bf16.msra.mxu0 %v662_v12  ;;  %684 = vmatpush3.bf16.msra.mxu1 %v683_v26  ;;  %v698_v49 = vpack.c.bf16 %v166_v48, %v165_v47  ;;  %v168_v51 = vld [vmem:[#allocation2 + $0xf8] sm:$0xff]  ;;  %v250_v53 = vld [vmem:[#allocation2 + $0x100] sm:$0xff]  ;;  %v251_v54 = vld [vmem:[#allocation2 + $0x108] sm:$0xff] }
  0x1f   :  { %664 = vmatprep.subr.bf16.mxu0 %v794_v0  ;;  %685 = vmatprep.subr.bf16.mxu1 %v794_v0  ;;  %v701_v52 = vpack.c.bf16 %v168_v51, %v167_v50  ;;  %v252_v55 = vld [vmem:[#allocation2 + $0x110] sm:$0xff]  ;;  %v704_v56 = vpack.c.bf16 %v251_v54, %v250_v53  ;;  %v253_v57 = vld [vmem:[#allocation2 + $0x118] sm:$0xff]  ;;  %v254_v59 = vld [vmem:[#allocation2 + $0x120] sm:$0xff] }
  0x20   :  { %v707_v58 = vpack.c.bf16 %v253_v57, %v252_v55  ;;  %v255_v60 = vld [vmem:[#allocation2 + $0x128] sm:$0xff]  ;;  %v874_v3 = vld [vmem:[%s906_s3] sm:$0xff]  ;;  %v256_v26 = vld [vmem:[#allocation2 + $0x130] sm:$0xff] }
  0x21   :  { %v710_v61 = vpack.c.bf16 %v255_v60, %v254_v59  ;;  %v138_v4 = vrot.slane %v874_v3, %v137_v2  ;;  %v143_v7 = vrot.slane %v874_v3, %v142_v5  ;;  %v53_v12 = vrot.slane %v874_v3, %v52_v10  ;;  %v258_v29 = vld [vmem:[#allocation2 + $0x140] sm:$0xff]  ;;  %v260_v32 = vld [vmem:[#allocation2 + $0x150] sm:$0xff]  ;;  %v263_v36 = vld [vmem:[#allocation2 + $0x168] sm:$0xff] }
  0x22   :  { %666 = vmatpush3.bf16.msra.mxu0 %v665_v15  ;;  %687 = vmatpush3.bf16.msra.mxu1 %v686_v37  ;;  %v265_v38 = vld [vmem:[#allocation2 + $0x178] sm:$0xff]  ;;  %v348_v41 = vld [vmem:[#allocation2 + $0x188] sm:$0xff]  ;;  %v349_v42 = vld [vmem:[#allocation2 + $0x190] sm:$0xff] }
  0x23   :  { %667 = vmatprep.subr.bf16.mxu0 %v794_v0  ;;  %688 = vmatprep.subr.bf16.mxu1 %v794_v0  ;;  %v350_v44 = vld [vmem:[#allocation2 + $0x198] sm:$0xff]  ;;  %v352_v47 = vld [vmem:[#allocation2 + $0x1a8] sm:$0xff]  ;;  %v353_v59 = vld [vmem:[#allocation2 + $0x1b0] sm:$0xff] }
  0x24   :  { %v731_v45 = vpack.c.bf16 %v350_v44, %v349_v42  ;;  %v354_v60 = vld [vmem:[#allocation2 + $0x1b8] sm:$0xff]  ;;  %v355_v62 = vld [vmem:[#allocation2 + $0x1c0] sm:$0xff]  ;;  %v356_v2 = vld [vmem:[#allocation2 + $0x1c8] sm:$0xff] }
  0x25   :  { %v357_v5 = vld [vmem:[#allocation2 + $0x1d0] sm:$0xff] }
  0x26   :  { %669 = vmatpush3.bf16.msra.mxu0 %v668_v21  ;;  %690 = vmatpush3.bf16.msra.mxu1 %v689_v40  ;;  %v347_v40 = vld [vmem:[#allocation2 + $0x180] sm:$0xff] }
  0x27   :  { %670 = vmatprep.subr.bf16.mxu0 %v794_v0  ;;  %691 = vmatprep.subr.bf16.mxu1 %v794_v0 }
  0x2a   :  { %672 = vmatpush3.bf16.msra.mxu0 %v671_v27  ;;  %693 = vmatpush3.bf16.msra.mxu1 %v692_v43  ;;  %v257_v27 = vld [vmem:[#allocation2 + $0x138] sm:$0xff]  ;;  %v728_v43 = vpack.c.bf16 %v348_v41, %v347_v40 }
  0x2b   :  { %673 = vmatprep.subr.bf16.mxu0 %v794_v0  ;;  %694 = vmatprep.subr.bf16.mxu1 %v794_v0  ;;  %v713_v28 = vpack.c.bf16 %v257_v27, %v256_v26 }
  0x2e   :  { %675 = vmatpush3.bf16.msra.mxu0 %v674_v30  ;;  %696 = vmatpush3.bf16.msra.mxu1 %v695_v46  ;;  %v259_v30 = vld [vmem:[#allocation2 + $0x148] sm:$0xff]  ;;  %v351_v46 = vld [vmem:[#allocation2 + $0x1a0] sm:$0xff] }
  0x2f   :  { %676 = vmatprep.subr.bf16.mxu0 %v794_v0  ;;  %697 = vmatprep.subr.bf16.mxu1 %v794_v0  ;;  %v716_v31 = vpack.c.bf16 %v259_v30, %v258_v29  ;;  %v734_v48 = vpack.c.bf16 %v352_v47, %v351_v46 }
  0x32   :  { %678 = vmatpush3.bf16.msra.mxu0 %v677_v33  ;;  %699 = vmatpush3.bf16.msra.mxu1 %v698_v49  ;;  %v261_v33 = vld [vmem:[#allocation2 + $0x158] sm:$0xff]  ;;  %v171_v49 = vsub.s32 3, %v868_v63 }
  0x33   :  { %703 = vmatprep.subr.bf16.mxu0 %v794_v0  ;;  %700 = vmatprep.subr.bf16.mxu1 %v794_v0  ;;  %v719_v35 = vpack.c.bf16 %v261_v33, %v260_v32 }
  0x34   :  { %v172_v50 = vrot.slane %v874_v3, %v171_v49 }
  0x35   :  { %548 = vmatmul.mubr.f32.vlgmr.msra.gmra.mrb[0].mxu0 %v31_v34  ;;  %v262_v34 = vld [vmem:[#allocation2 + $0x160] sm:$0xff] }
  0x36   :  { %617 = vmatprep.mubr.msk.f32.mxu0 %vm795_vm0, %v796_v1  ;;  %702 = vmatpush3.bf16.msra.mxu1 %v701_v52  ;;  %v722_v37 = vpack.c.bf16 %v263_v36, %v262_v34 }
  0x37   :  { %727 = vmatprep.subr.bf16.mxu1 %v794_v0  ;;  %705 = vmatpush3.bf16.msra.mxu0 %v704_v56 }
  0x38   :  { %706 = vmatprep.subr.bf16.mxu0 %v794_v0 }
  0x3b   :  { %708 = vmatpush3.bf16.msra.mxu0 %v707_v58 }
  0x3c   :  { %709 = vmatprep.subr.bf16.mxu0 %v794_v0 }
  0x3f   :  { %711 = vmatpush3.bf16.msra.mxu0 %v710_v61  ;;  %v737_v61 = vpack.c.bf16 %v354_v60, %v353_v59 }
  0x40   :  { %712 = vmatprep.subr.bf16.mxu0 %v794_v0 }
  0x43   :  { %714 = vmatpush3.bf16.msra.mxu0 %v713_v28 }
  0x44   :  { %715 = vmatprep.subr.bf16.mxu0 %v794_v0 }
  0x47   :  { %717 = vmatpush3.bf16.msra.mxu0 %v716_v31 }
  0x48   :  { %718 = vmatprep.subr.bf16.mxu0 %v794_v0 }
  0x4b   :  { %720 = vmatpush3.bf16.msra.mxu0 %v719_v35 }
  0x4c   :  { %721 = vmatprep.subr.bf16.mxu0 %v794_v0 }
  0x4f   :  { %723 = vmatpush3.bf16.msra.mxu0 %v722_v37 }
  0x50   :  { %724 = vmatprep.subr.bf16.mxu0 %v794_v0 }
  0x95   :  { %v133_v6 = vpop.permute.xlu0 %132 }
  0x96   :  { %v139_v8 = vmul.f32 %v138_v4, %v133_v6  ;;  %v740_v4 = vpack.c.bf16 %v356_v2, %v355_v62  ;;  %v358_v6 = vld [vmem:[#allocation2 + $0x1d8] sm:$0xff] }
  0x98   :  { %v144_v9 = vadd.f32 %v143_v7, %v139_v8  ;;  %v359_v7 = vld [vmem:[#allocation2 + $0x1e0] sm:$0xff]  ;;  %v743_v8 = vpack.c.bf16 %v358_v6, %v357_v5 }
  0x9a   :  { %v146_v11 = vmin.f32 %v144_v9, 0.0  ;;  %vm145_vm1 = vcmp.gt.f32.partialorder %v144_v9, 0.0 }
  0x9c   :  { %v147_v13 = vmul.f32 1.442695, %v146_v11  ;;  %v361_v11 = vld [vmem:[#allocation2 + $0x1f0] sm:$0xff] }
  0x9e   :  { %759 = vpow2.f32 %v147_v13 }
  0xa8   :  { %v760_v19 = vpop.eup %759 }
  0xa9   :  { %v444_v20 = vadd.f32 -1.0, %v760_v19 }
  0xab   :  { %v150_v24 = vsel %vm145_vm1, %v144_v9, %v444_v20  ;;  %v360_v9 = vld [vmem:[#allocation2 + $0x1e8] sm:$0xff] }
  0xac   :  { %v746_v10 = vpack.c.bf16 %v360_v9, %v359_v7 }
 0x108   :  { %v120_v14 = vpop.f32.mrb[0].mxu0 }
 0x109   :  { %v121_v15 = vadd.f32 %v120_v14, %v53_v12  ;;  %v549_v16 = vpop.f32.mrb[1].mxu0  ;;  %v362_v12 = vld [vmem:[#allocation2 + $0x1f8] sm:$0xff]  ;;  %v268_v14 = vsub.s32 4, %v868_v63 }
 0x10a   :  { %v749_v13 = vpack.c.bf16 %v362_v12, %v361_v11 }
 0x10b   :  { %v125_v17 = vmin.f32 %v121_v15, 0.0  ;;  %vm124_vm2 = vcmp.gt.f32.partialorder %v121_v15, 0.0 }
 0x10d   :  { %v126_v18 = vmul.f32 1.442695, %v125_v17 }
 0x10f   :  { %761 = vpow2.f32 %v126_v18 }
 0x119   :  { %v762_v21 = vpop.eup %761 }
 0x11a   :  { %v443_v22 = vadd.f32 -1.0, %v762_v21 }
 0x11c   :  { %v129_v23 = vsel %vm124_vm2, %v121_v15, %v443_v22  ;;  %v269_v15 = vrot.slane %v874_v3, %v268_v14 }
 0x11d   :  { %v151_v25 = vadd.f32 %v150_v24, %v129_v23  ;;  %v365_v24 = vsub.s32 5, %v868_v63 }
 0x11f   :  { %583 = vmatmul.mubr.f32.vlgmr.msra.gmra.mrb[0].mxu1 %v151_v25 }
 0x120   :  { %652 = vmatprep.mubr.msk.f32.mxu1 %vm795_vm0, %v796_v1  ;;  %v264_v1 = vld [vmem:[#allocation2 + $0x170] sm:$0xff]  ;;  %729 = vmatpush3.bf16.msra.mxu1 %v728_v43 }
 0x121   :  { %v725_v39 = vpack.c.bf16 %v265_v38, %v264_v1  ;;  %730 = vmatprep.subr.bf16.mxu1 %v794_v0 }
 0x123   :  { %726 = vmatpush3.bf16.msra.mxu0 %v725_v39 }
 0x124   :  { %732 = vmatpush3.bf16.msra.mxu1 %v731_v45 }
 0x125   :  { %733 = vmatprep.subr.bf16.mxu1 %v794_v0 }
 0x128   :  { %735 = vmatpush3.bf16.msra.mxu1 %v734_v48 }
 0x129   :  { %736 = vmatprep.subr.bf16.mxu1 %v794_v0 }
 0x12c   :  { %738 = vmatpush3.bf16.msra.mxu1 %v737_v61 }
 0x12d   :  { %739 = vmatprep.subr.bf16.mxu1 %v794_v0 }
 0x130   :  { %741 = vmatpush3.bf16.msra.mxu1 %v740_v4 }
 0x131   :  { %742 = vmatprep.subr.bf16.mxu1 %v794_v0 }
 0x134   :  { %744 = vmatpush3.bf16.msra.mxu1 %v743_v8 }
 0x135   :  { %745 = vmatprep.subr.bf16.mxu1 %v794_v0 }
 0x138   :  { %747 = vmatpush3.bf16.msra.mxu1 %v746_v10 }
 0x139   :  { %748 = vmatprep.subr.bf16.mxu1 %v794_v0  ;;  %v366_v0 = vrot.slane %v874_v3, %v365_v24 }
 0x13c   :  { %750 = vmatpush3.bf16.msra.mxu1 %v749_v13 }
 0x1f2   :  { %v239_v51 = vpop.f32.mrb[0].mxu1 }
 0x1f3   :  { %v240_v52 = vadd.f32 %v239_v51, %v172_v50  ;;  %v584_v53 = vpop.f32.mrb[1].mxu1 }
 0x1f5   :  { %v244_v54 = vmin.f32 %v240_v52, 0.0  ;;  %vm243_vm3 = vcmp.gt.f32.partialorder %v240_v52, 0.0 }
 0x1f7   :  { %v245_v55 = vmul.f32 1.442695, %v244_v54 }
 0x1f9   :  { %763 = vpow2.f32 %v245_v55 }
 0x203   :  { %v764_v56 = vpop.eup %763 }
 0x204   :  { %v445_v57 = vadd.f32 -1.0, %v764_v56 }
 0x206   :  { %v248_v58 = vsel %vm243_vm3, %v240_v52, %v445_v57 }
 0x207   :  { %618 = vmatmul.mubr.f32.vlgmr.msra.gmra.mrb[2].mxu0 %v248_v58 }
 0x2da   :  { %v336_v16 = vpop.f32.mrb[2].mxu0 }
 0x2db   :  { %v337_v17 = vadd.f32 %v336_v16, %v269_v15  ;;  %v619_v18 = vpop.f32.mrb[3].mxu0 }
 0x2dd   :  { %v341_v19 = vmin.f32 %v337_v17, 0.0  ;;  %vm340_vm4 = vcmp.gt.f32.partialorder %v337_v17, 0.0 }
 0x2df   :  { %v342_v20 = vmul.f32 1.442695, %v341_v19 }
 0x2e1   :  { %765 = vpow2.f32 %v342_v20 }
 0x2eb   :  { %v766_v21 = vpop.eup %765 }
 0x2ec   :  { %v446_v22 = vadd.f32 -1.0, %v766_v21 }
 0x2ee   :  { %v345_v23 = vsel %vm340_vm4, %v337_v17, %v446_v22 }
 0x2ef   :  { %653 = vmatmul.mubr.f32.vlgmr.msra.gmra.mrb[2].mxu1 %v345_v23 }
 0x3c2   :  { %v433_v25 = vpop.f32.mrb[2].mxu1 }
 0x3c3   :  { %v434_v26 = vadd.f32 %v433_v25, %v366_v0  ;;  %v654_v27 = vpop.f32.mrb[3].mxu1 }
 0x3c5   :  { %437 = vst [vmem:[%s907_s4] sm:$0xff] %v434_v26 }
 0x3c6   :  { %442 = vsyncpa [#allocation3], 1 }

</bundles_post_ra>
